<compile_context>
chip_gen: v5e
topology: v5e:2x2
jax: 0.10.0
libtpu: 0.0.40
codegen_flags: <defaults>
</compile_context>

<pallas_src>
import math
from functools import partial

import jax
import jax.numpy as jnp
from jax.experimental import pallas as pl
from jax.experimental.pallas import tpu as pltpu


def _round_up(n, m):
    return ((n + m - 1) // m) * m


def _largest_divisor_leq(n, limit):
    """Largest g with 1 <= g <= limit and n % g == 0."""
    limit = max(1, min(n, limit))
    for g in range(limit, 0, -1):
        if n % g == 0:
            return g
    return 1


def _groupwise_linear_kernel(x_ref, w_ref, b_ref, o_ref, *, compute_dtype=None):
    # x_ref: (Bt, G*K)   packed batch tile (K = num_class * hidden_dim)
    # w_ref: (G*K, Np)   G-fold block-diagonal weight, VMEM-resident
    # b_ref: (1,   Np)   packed bias, VMEM-resident
    # o_ref: (Bt,  Np)   packed output tile (Np = G * num_class)
    x = x_ref[...]
    w = w_ref[...]
    if compute_dtype is not None:            # bf16 inputs (v5e), f32 accumulate
        x = x.astype(compute_dtype)
        w = w.astype(compute_dtype)
    acc = jnp.dot(x, w, preferred_element_type=jnp.float32)
    o_ref[...] = (acc + b_ref[...].astype(jnp.float32)).astype(o_ref.dtype)


def groupwise_linear(x, W, b, *, block_rows=None, compute_dtype=None):
    """x: (B, C, D); W: (1, C, D); b: (1, C). Returns (W * x).sum(-1) + b -> (B, C)."""
    B, C, D = x.shape
    assert W.shape == (1, C, D)
    assert b.shape == (1, C)
    dtype = x.dtype
    itemsize = jnp.dtype(dtype).itemsize

    K = C * D
    # ---- batch-row packing factor: pack G rows per (<=128-lane) output row --
    G = _largest_divisor_leq(B, max(1, 128 // C)) if C < 128 else 1
    Bp = B // G            # packed batch rows
    GK = G * K             # packed contraction length (full-extent block dim)
    Np = G * C             # packed output width (<= 128 when C < 128)

    # ---- one-time wrapper relayout (free / cheap XLA ops) --------------------
    # x: (B, C, D) -> (Bp, G*K) is a contiguous (free) reshape; no padding.
    x_pk = x.reshape(Bp, GK)

    # W_pk[g*K + c*D + d, g*C + c] = W[0, c, d]; scatter build (no (C,D,C) blowup).
    rows = jnp.arange(GK)
    cols = (rows // K) * C + (rows % K) // D
    vals = jnp.tile(W.reshape(-1).astype(dtype), G)
    W_pk = jnp.zeros((GK, Np), dtype=dtype).at[rows, cols].set(vals)

    # b_pk[0, g*C + c] = b[0, c]
    b_pk = jnp.tile(b.astype(dtype), (1, G))

    # ---- batch tiling: ~6 MiB of x per step, >=2 steps when enough work -----
    if block_rows is None:
        bt = max(1, (6 << 20) // (GK * itemsize))      # ~6 MiB x-tile
        if Bp >= 16:
            bt = min(bt, (Bp + 1) // 2)                # >=2 grid steps (v7x, 2 TCs)
    else:
        bt = block_rows
    if bt >= Bp or Bp <= 8:
        bt = Bp                                        # full-extent rows (always legal)
    else:
        bt = max(8, (bt // 8) * 8)                     # sublane-aligned row tiles
    grid_b = pl.cdiv(Bp, bt)

    # ---- VMEM budget for the double-buffered auto-pipeline -------------------
    gk_vmem = _round_up(GK, 128)
    np_vmem = _round_up(Np, 128)
    footprint = itemsize * (
        2 * bt * gk_vmem          # double-buffered x tiles
        + 2 * bt * np_vmem        # double-buffered output tiles
        + 2 * gk_vmem * np_vmem   # resident block-diagonal weight (+ headroom)
        + 2 * np_vmem             # bias
    )
    vmem_limit = int(min(max(footprint * 5 // 4, 16 << 20), 48 << 20))

    cost = pl.CostEstimate(
        flops=2 * Bp * GK * np_vmem,   # actual MXU work (lane-padded N)
        transcendentals=0,
        bytes_accessed=itemsize * (Bp * GK + GK * Np + Np + Bp * Np),
    )

    out_pk = pl.pallas_call(
        partial(_groupwise_linear_kernel, compute_dtype=compute_dtype),
        out_shape=jax.ShapeDtypeStruct((Bp, Np), dtype),
        grid_spec=pl.GridSpec(
            grid=(grid_b,),
            in_specs=[
                pl.BlockSpec((bt, GK), lambda i: (i, 0)),   # x (auto-pipelined)
                pl.BlockSpec((GK, Np), lambda i: (0, 0)),   # W_pk (resident)
                pl.BlockSpec((1, Np), lambda i: (0, 0)),    # bias (resident)
            ],
            out_specs=pl.BlockSpec((bt, Np), lambda i: (i, 0)),
        ),
        compiler_params=pltpu.CompilerParams(
            dimension_semantics=("parallel",),
            vmem_limit_bytes=vmem_limit,
        ),
        cost_estimate=cost,
    )(x_pk, W_pk, b_pk)

    # (Bp, G*C) -> (B, C): free contiguous reshape, no slice copy.
    return out_pk.reshape(B, C)


def reference(x, W, b):
    return jnp.sum(W * x, axis=-1) + b


if __name__ == "__main__":
    # Module config consistent with the forward semantics.
    num_class = 8
    hidden_dim = 32
    batch = 2

    key = jax.random.PRNGKey(0)
    kW, kb, kx, kx2, kx3 = jax.random.split(key, 5)

    # Deterministic init mirroring reset_parameters(): uniform(-stdv, stdv).
    stdv = 1.0 / math.sqrt(hidden_dim)
    W = jax.random.uniform(kW, (1, num_class, hidden_dim),
                           minval=-stdv, maxval=stdv, dtype=jnp.float32)
    b = jax.random.uniform(kb, (1, num_class),
                           minval=-stdv, maxval=stdv, dtype=jnp.float32)

    # Small deterministic example (B=2): packed to (1, 2*256) x (512, 16).
    x = jax.random.normal(kx, (batch, num_class, hidden_dim), dtype=jnp.float32)
    out = jax.block_until_ready(groupwise_linear(x, W, b))
    ref = reference(x, W, b)
    assert out.shape == (batch, num_class)
    assert jnp.allclose(out, ref, atol=1e-5, rtol=1e-5), "mismatch vs reference"

    # Multi-grid-step path with a partial tail tile:
    # B=656 -> G=16, Bp=41 packed rows, block_rows=8 -> 6 grid steps.
    x_big = jax.random.normal(kx2, (656, num_class, hidden_dim), dtype=jnp.float32)
    out_big = jax.block_until_ready(groupwise_linear(x_big, W, b, block_rows=8))
    ref_big = reference(x_big, W, b)
    assert out_big.shape == (656, num_class)
    assert jnp.allclose(out_big, ref_big, atol=1e-5, rtol=1e-5), "mismatch (tiled)"

    # Batch not divisible by 128//C: B=20 -> G=10, packed width 80 (<128 lanes),
    # exercises the full-extent / masked-store output path.
    x_odd = jax.random.normal(kx3, (20, num_class, hidden_dim), dtype=jnp.float32)
    out_odd = jax.block_until_ready(groupwise_linear(x_odd, W, b))
    ref_odd = reference(x_odd, W, b)
    assert out_odd.shape == (20, num_class)
    assert jnp.allclose(out_odd, ref_odd, atol=1e-5, rtol=1e-5), "mismatch (odd batch)"

    # Optional bf16-matmul path (recommended on v5e to stay DMA-bound);
    # f32 accumulation kept, tolerance relaxed accordingly.
    out_bf16 = jax.block_until_ready(
        groupwise_linear(x_big, W, b, block_rows=8, compute_dtype=jnp.bfloat16))
    assert jnp.allclose(out_bf16, ref_big, atol=5e-2, rtol=5e-2), "mismatch (bf16)"

    print("KERNEL_OK")
</pallas_src>

<mosaic_0001>
module attributes {stable_mosaic.version = 11 : i64} {
  func.func @_groupwise_linear_kernel(%arg0: i32, %arg1: memref<1x512xf32, #tpu.memory_space<vmem>>, %arg2: memref<512x16xf32, #tpu.memory_space<vmem>>, %arg3: memref<1x16xf32, #tpu.memory_space<vmem>>, %arg4: memref<1x16xf32, #tpu.memory_space<vmem>>) attributes {dimension_semantics = [#tpu.dimension_semantics<parallel>], iteration_bounds = array<i64: 1>, scalar_prefetch = 0 : i64, scratch_operands = 0 : i64, tpu.core_type = #tpu.core_type<tc>, window_params = [{transform_indices = @transform_0, window_bounds = array<i64: 1, 512>}, {pipeline_mode = #tpu.pipeline_mode<synchronous>, transform_indices = @transform_1, window_bounds = array<i64: 512, 16>}, {pipeline_mode = #tpu.pipeline_mode<synchronous>, transform_indices = @transform_2, window_bounds = array<i64: 1, 16>}, {transform_indices = @transform_3, window_bounds = array<i64: 1, 16>}]} {
    %c0 = arith.constant 0 : index
    %c0_0 = arith.constant 0 : index
    %0 = vector.load %arg1[%c0, %c0_0] : memref<1x512xf32, #tpu.memory_space<vmem>>, vector<1x512xf32>
    %c0_1 = arith.constant 0 : index
    %c0_2 = arith.constant 0 : index
    %1 = vector.load %arg2[%c0_1, %c0_2] : memref<512x16xf32, #tpu.memory_space<vmem>>, vector<512x16xf32>
    %cst = arith.constant dense<0.000000e+00> : vector<1x16xf32>
    %2 = tpu.matmul %0, %1, %cst {dimension_numbers = #tpu.dot_dimension_numbers<[1], [0], [0], [1], [0, 0, 1, 1], [], []>} : vector<1x512xf32>, vector<512x16xf32>, vector<1x16xf32> -> vector<1x16xf32>
    %c0_3 = arith.constant 0 : index
    %c0_4 = arith.constant 0 : index
    %3 = vector.load %arg3[%c0_3, %c0_4] : memref<1x16xf32, #tpu.memory_space<vmem>>, vector<1x16xf32>
    %4 = arith.addf %2, %3 : vector<1x16xf32>
    %c0_5 = arith.constant 0 : index
    %c0_6 = arith.constant 0 : index
    %5 = vector.load %arg4[%c0_5, %c0_6] : memref<1x16xf32, #tpu.memory_space<vmem>>, vector<1x16xf32>
    tpu.vector_store %arg4[%c0_5, %c0_6], %4 {strides = array<i32>} : memref<1x16xf32, #tpu.memory_space<vmem>>, vector<1x16xf32>,
    return
  }
  func.func @transform_0(%arg0: i32) -> (i32, i32) {
    %c0_i32 = arith.constant 0 : i32
    %c0_i32_0 = arith.constant 0 : i32
    return %arg0, %c0_i32 : i32, i32
  }
  func.func @transform_1(%arg0: i32) -> (i32, i32) {
    %c0_i32 = arith.constant 0 : i32
    %c0_i32_0 = arith.constant 0 : i32
    %c0_i32_1 = arith.constant 0 : i32
    return %c0_i32, %c0_i32_0 : i32, i32
  }
  func.func @transform_2(%arg0: i32) -> (i32, i32) {
    %c0_i32 = arith.constant 0 : i32
    %c0_i32_0 = arith.constant 0 : i32
    %c0_i32_1 = arith.constant 0 : i32
    return %c0_i32, %c0_i32_0 : i32, i32
  }
  func.func @transform_3(%arg0: i32) -> (i32, i32) {
    %c0_i32 = arith.constant 0 : i32
    %c0_i32_0 = arith.constant 0 : i32
    return %arg0, %c0_i32 : i32, i32
  }
}

</mosaic_0001>

<bundles_post_ra>
// kernel: tpu_custom_call.1
= control target key start
LH: loop header
LB: loop body
LE: loop exit
PB: predicated region body
PF: predicated region fallthrough
CT: control target
= control target key end

     0   :  { %s437_s0 = inlined_call_operand.vmem [shape: f32[1,512], index: 0, kind: input, shape index: {}]   ;;  %s438_s1 = inlined_call_operand.vmem [shape: f32[512,16], index: 1, kind: input, shape index: {}]   ;;  %s439_s2 = inlined_call_operand.vmem [shape: f32[1,16], index: 2, kind: input, shape index: {}]   ;;  %s440_s3 = inlined_call_operand.hbm [shape: f32[1,16], index: 3, kind: output, shape index: {}]  }
   0x1   :  { %v63_v0 = vld [vmem:[%s438_s1 + $0x178] sm:$0xff]  ;;  %v62_v2 = vld [vmem:[%s438_s1 + $0x170] sm:$0xff]  ;;  %v61_v6 = vld [vmem:[%s438_s1 + $0x168] sm:$0xff] }
   0x2   :  { %v31_v1 = vld [vmem:[%s438_s1 + $0x78] sm:$0xff]  ;;  %130 = vmatpush.msra.mxu2 %v63_v0  ;;  %v30_v4 = vld [vmem:[%s438_s1 + $0x70] sm:$0xff]  ;;  %v29_v8 = vld [vmem:[%s438_s1 + $0x68] sm:$0xff] }
   0x3   :  { %90 = vmatpush.msra.mxu0 %v31_v1  ;;  %v79_v3 = vld [vmem:[%s438_s1 + $0x1f8] sm:$0xff]  ;;  %v78_v7 = vld [vmem:[%s438_s1 + $0x1f0] sm:$0xff]  ;;  %v77_v10 = vld [vmem:[%s438_s1 + $0x1e8] sm:$0xff] }
   0x4   :  { %v47_v5 = vld [vmem:[%s438_s1 + $0xf8] sm:$0xff]  ;;  %150 = vmatpush.msra.mxu3 %v79_v3  ;;  %131 = vmatpush.msra.mxu2 %v62_v2  ;;  %v46_v9 = vld [vmem:[%s438_s1 + $0xf0] sm:$0xff]  ;;  %v60_v11 = vld [vmem:[%s438_s1 + $0x160] sm:$0xff] }
   0x5   :  { %110 = vmatpush.msra.mxu1 %v47_v5  ;;  %91 = vmatpush.msra.mxu0 %v30_v4  ;;  %v28_v12 = vld [vmem:[%s438_s1 + $0x60] sm:$0xff]  ;;  %v45_v13 = vld [vmem:[%s438_s1 + $0xe8] sm:$0xff]  ;;  %v59_v16 = vld [vmem:[%s438_s1 + $0x158] sm:$0xff] }
   0x6   :  { %151 = vmatpush.msra.mxu3 %v78_v7  ;;  %132 = vmatpush.msra.mxu2 %v61_v6  ;;  %v76_v14 = vld [vmem:[%s438_s1 + $0x1e0] sm:$0xff]  ;;  %v27_v17 = vld [vmem:[%s438_s1 + $0x58] sm:$0xff]  ;;  %v58_v20 = vld [vmem:[%s438_s1 + $0x150] sm:$0xff] }
   0x7   :  { %111 = vmatpush.msra.mxu1 %v46_v9  ;;  %92 = vmatpush.msra.mxu0 %v29_v8  ;;  %v44_v15 = vld [vmem:[%s438_s1 + $0xe0] sm:$0xff]  ;;  %v75_v18 = vld [vmem:[%s438_s1 + $0x1d8] sm:$0xff]  ;;  %v26_v21 = vld [vmem:[%s438_s1 + $0x50] sm:$0xff] }
   0x8   :  { %152 = vmatpush.msra.mxu3 %v77_v10  ;;  %133 = vmatpush.msra.mxu2 %v60_v11  ;;  %v43_v19 = vld [vmem:[%s438_s1 + $0xd8] sm:$0xff]  ;;  %v74_v22 = vld [vmem:[%s438_s1 + $0x1d0] sm:$0xff]  ;;  %v57_v24 = vld [vmem:[%s438_s1 + $0x148] sm:$0xff] }
   0x9   :  { %112 = vmatpush.msra.mxu1 %v45_v13  ;;  %93 = vmatpush.msra.mxu0 %v28_v12  ;;  %v42_v23 = vld [vmem:[%s438_s1 + $0xd0] sm:$0xff]  ;;  %v25_v25 = vld [vmem:[%s438_s1 + $0x48] sm:$0xff]  ;;  %v56_v28 = vld [vmem:[%s438_s1 + $0x140] sm:$0xff] }
   0xa   :  { %153 = vmatpush.msra.mxu3 %v76_v14  ;;  %134 = vmatpush.msra.mxu2 %v59_v16  ;;  %v73_v26 = vld [vmem:[%s438_s1 + $0x1c8] sm:$0xff]  ;;  %v24_v29 = vld [vmem:[%s438_s1 + $0x40] sm:$0xff]  ;;  %v55_v32 = vld [vmem:[%s438_s1 + $0x138] sm:$0xff] }
   0xb   :  { %113 = vmatpush.msra.mxu1 %v44_v15  ;;  %94 = vmatpush.msra.mxu0 %v27_v17  ;;  %v41_v27 = vld [vmem:[%s438_s1 + $0xc8] sm:$0xff]  ;;  %v72_v30 = vld [vmem:[%s438_s1 + $0x1c0] sm:$0xff]  ;;  %v23_v33 = vld [vmem:[%s438_s1 + $0x38] sm:$0xff] }
   0xc   :  { %154 = vmatpush.msra.mxu3 %v75_v18  ;;  %135 = vmatpush.msra.mxu2 %v58_v20  ;;  %v40_v31 = vld [vmem:[%s438_s1 + $0xc0] sm:$0xff]  ;;  %v71_v34 = vld [vmem:[%s438_s1 + $0x1b8] sm:$0xff]  ;;  %v54_v36 = vld [vmem:[%s438_s1 + $0x130] sm:$0xff] }
   0xd   :  { %114 = vmatpush.msra.mxu1 %v43_v19  ;;  %95 = vmatpush.msra.mxu0 %v26_v21  ;;  %v39_v35 = vld [vmem:[%s438_s1 + $0xb8] sm:$0xff]  ;;  %v22_v37 = vld [vmem:[%s438_s1 + $0x30] sm:$0xff]  ;;  %v53_v40 = vld [vmem:[%s438_s1 + $0x128] sm:$0xff] }
   0xe   :  { %155 = vmatpush.msra.mxu3 %v74_v22  ;;  %136 = vmatpush.msra.mxu2 %v57_v24  ;;  %v70_v38 = vld [vmem:[%s438_s1 + $0x1b0] sm:$0xff]  ;;  %v21_v41 = vld [vmem:[%s438_s1 + $0x28] sm:$0xff]  ;;  %v52_v44 = vld [vmem:[%s438_s1 + $0x120] sm:$0xff] }
   0xf   :  { %115 = vmatpush.msra.mxu1 %v42_v23  ;;  %96 = vmatpush.msra.mxu0 %v25_v25  ;;  %v38_v39 = vld [vmem:[%s438_s1 + $0xb0] sm:$0xff]  ;;  %v69_v42 = vld [vmem:[%s438_s1 + $0x1a8] sm:$0xff]  ;;  %v20_v45 = vld [vmem:[%s438_s1 + $0x20] sm:$0xff] }
  0x10   :  { %156 = vmatpush.msra.mxu3 %v73_v26  ;;  %137 = vmatpush.msra.mxu2 %v56_v28  ;;  %v37_v43 = vld [vmem:[%s438_s1 + $0xa8] sm:$0xff]  ;;  %v68_v46 = vld [vmem:[%s438_s1 + $0x1a0] sm:$0xff]  ;;  %v51_v48 = vld [vmem:[%s438_s1 + $0x118] sm:$0xff] }
  0x11   :  { %116 = vmatpush.msra.mxu1 %v41_v27  ;;  %97 = vmatpush.msra.mxu0 %v24_v29  ;;  %v36_v47 = vld [vmem:[%s438_s1 + $0xa0] sm:$0xff]  ;;  %v19_v49 = vld [vmem:[%s438_s1 + $0x18] sm:$0xff] }
  0x12   :  { %157 = vmatpush.msra.mxu3 %v72_v30  ;;  %138 = vmatpush.msra.mxu2 %v55_v32 }
  0x13   :  { %117 = vmatpush.msra.mxu1 %v40_v31  ;;  %98 = vmatpush.msra.mxu0 %v23_v33 }
  0x14   :  { %158 = vmatpush.msra.mxu3 %v71_v34  ;;  %139 = vmatpush.msra.mxu2 %v54_v36 }
  0x15   :  { %118 = vmatpush.msra.mxu1 %v39_v35  ;;  %99 = vmatpush.msra.mxu0 %v22_v37 }
  0x16   :  { %159 = vmatpush.msra.mxu3 %v70_v38  ;;  %140 = vmatpush.msra.mxu2 %v53_v40 }
  0x17   :  { %119 = vmatpush.msra.mxu1 %v38_v39  ;;  %100 = vmatpush.msra.mxu0 %v21_v41 }
  0x18   :  { %160 = vmatpush.msra.mxu3 %v69_v42 }
  0x19   :  { %120 = vmatpush.msra.mxu1 %v37_v43 }
  0x1a   :  { %8 = vsyncpa [#allocation3], 0  ;;  %141 = vmatpush.msra.mxu2 %v52_v44  ;;  %101 = vmatpush.msra.mxu0 %v20_v45  ;;  %v67_v50 = vld [vmem:[%s438_s1 + $0x198] sm:$0xff]  ;;  %v50_v52 = vld [vmem:[%s438_s1 + $0x110] sm:$0xff]  ;;  %s215_s8 = smov [#allocation2]   ;;  %s179_s11 = sshll.u32 %s440_s3, 4  ;;  %s180_s11 = int_to_ptr.hbm [resolvable:$true] %s179_s11 }
  0x1b   :  { %v35_v51 = vld [vmem:[%s438_s1 + $0x98] sm:$0xff]  ;;  %161 = vmatpush.msra.mxu3 %v68_v46  ;;  %121 = vmatpush.msra.mxu1 %v36_v47  ;;  %v18_v53 = vld [vmem:[%s438_s1 + $0x10] sm:$0xff]  ;;  %v15_v56 = vld [vmem:[%s437_s0] sm:$0xf]  ;;  %s177_s9 = sshll.u32 %s215_s8, 4  ;;  %vm170_vm0 = vcmask 122880   ;;  %s178_s9 = int_to_ptr.vmem [resolvable:$true] %s177_s9 }
  0x1c   :  { %142 = vmatpush.msra.mxu2 %v51_v48  ;;  %102 = vmatpush.msra.mxu0 %v19_v49  ;;  %v66_v54 = vld [vmem:[%s438_s1 + $0x190] sm:$0xff]  ;;  %v49_v57 = vld [vmem:[%s438_s1 + $0x108] sm:$0xff]  ;;  %v48_v61 = vld [vmem:[%s438_s1 + $0x100] sm:$0xff]  ;;  %v84_v62 = vperm.slane %v15_v56, 2  ;;  %v82_v1 = vperm.slane %v15_v56, 0  ;;  %v85_v2 = vperm.slane %v15_v56, 3 }
  0x1d   :  { %v34_v55 = vld [vmem:[%s438_s1 + $0x90] sm:$0xff]  ;;  %162 = vmatpush.msra.mxu3 %v67_v50  ;;  %122 = vmatpush.msra.mxu1 %v35_v51  ;;  %v17_v58 = vld [vmem:[%s438_s1 + $0x8] sm:$0xff]  ;;  %v16_v63 = vld [vmem:[%s438_s1] sm:$0xff]  ;;  %v83_v4 = vperm.slane %v15_v56, 1 }
  0x1e   :  { %143 = vmatpush.msra.mxu2 %v50_v52  ;;  %103 = vmatpush.msra.mxu0 %v18_v53  ;;  %v65_v59 = vld [vmem:[%s438_s1 + $0x188] sm:$0xff]  ;;  %v64_v0 = vld [vmem:[%s438_s1 + $0x180] sm:$0xff] }
  0x1f   :  { %v33_v60 = vld [vmem:[%s438_s1 + $0x88] sm:$0xff]  ;;  %163 = vmatpush.msra.mxu3 %v66_v54  ;;  %123 = vmatpush.msra.mxu1 %v34_v55  ;;  %v32_v3 = vld [vmem:[%s438_s1 + $0x80] sm:$0xff] }
  0x20   :  { %144 = vmatpush.msra.mxu2 %v49_v57  ;;  %104 = vmatpush.msra.mxu0 %v17_v58  ;;  %v80_v5 = vld [vmem:[%s439_s2] sm:$0x1] }
  0x21   :  { %164 = vmatpush.msra.mxu3 %v65_v59  ;;  %124 = vmatpush.msra.mxu1 %v33_v60 }
  0x22   :  { %145 = vmatpush.msra.mxu2 %v48_v61  ;;  %105 = vmatpush.msra.mxu0 %v16_v63 }
  0x23   :  { %146 = vmatmul.f32.vlgmr.msra.gmra.mxu2 %v84_v62  ;;  %165 = vmatpush.msra.mxu3 %v64_v0 }
  0x24   :  { %106 = vmatmul.f32.vlgmr.msra.gmra.mxu0 %v82_v1  ;;  %166 = vmatmul.f32.vlgmr.msra.gmra.mxu3 %v85_v2 }
  0x25   :  { %125 = vmatpush.msra.mxu1 %v32_v3 }
  0x26   :  { %126 = vmatmul.f32.vlgmr.msra.gmra.mxu1 %v83_v4 }
  0xa1   :  { %v107_v6 = vpop.f32.mrf.mxu0 }
  0xa2   :  { %v108_v7 = vadd.f32 %v107_v6, %v80_v5 }
  0xa3   :  { %v127_v8 = vpop.f32.mrf.mxu1 }
  0xa4   :  { %v128_v9 = vadd.f32 %v127_v8, %v108_v7 }
  0xa6   :  { %v147_v10 = vpop.f32.mrf.mxu2 }
  0xa7   :  { %v148_v11 = vadd.f32 %v147_v10, %v128_v9  ;;  %v167_v12 = vpop.f32.mrf.mxu3 }
  0xa9   :  { %v168_v13 = vadd.f32 %v167_v12, %v148_v11 }
  0xab   :  { %171 = vst.msk [vmem:[#allocation2] sm:$0x1] %vm170_vm0, %v168_v13 }
  0xac   :  { %182 = dma.vmem_to_hbm [thread:$0]  %s178_s9, 16, %s180_s11, [#allocation3]  }
  0xad   :  { %213 = dma.done.wait [#allocation3], 16  }
  0xae   :  { %214 = vsyncadd [#allocation3], 4294967280 }
  0xaf   :  { %187 = vsyncpa [#allocation3], 1 }

</bundles_post_ra>
